<compile_context>
chip_gen: v7x
topology: tpu7x:2x2x1
jax: 0.10.0
libtpu: 0.0.40
codegen_flags: <defaults>
</compile_context>

<pallas_src>
import functools
import math

import jax
import jax.numpy as jnp
from jax.experimental import pallas as pl
from jax.experimental.pallas import tpu as pltpu


def _round_up(x, m):
    return ((x + m - 1) // m) * m


def _generator_kernel(x_ref, w_ref, b_ref, o_ref, acc_ref, *, log_softmax):
    """Fused linear (K-tiled) + bias + log_softmax over the vocab axis.

    x_ref:   (TR, TK)    tile of input rows x hidden slab
    w_ref:   (TK, V)     K-slab of the (pre-transposed) weight
    b_ref:   (1, V)      bias
    o_ref:   (TR, V)     output log-probs (or raw logits)
    acc_ref: (TR, V) f32 accumulator scratch, persistent across the K axis
    """
    k = pl.program_id(1)

    @pl.when(k == 0)
    def _():
        acc_ref[...] = jnp.zeros_like(acc_ref)

    # Native-dtype operands straight to the MXU; accumulate in f32.
    acc_ref[...] += jnp.dot(
        x_ref[...], w_ref[...], preferred_element_type=jnp.float32
    )

    @pl.when(k == pl.num_programs(1) - 1)
    def _():
        logits = acc_ref[...] + b_ref[...].astype(jnp.float32)
        if log_softmax:
            # numerically stable log_softmax along dim=-1 (matches F.log_softmax)
            m = jnp.max(logits, axis=-1, keepdims=True)
            shifted = logits - m
            lse = jnp.log(jnp.sum(jnp.exp(shifted), axis=-1, keepdims=True))
            o_ref[...] = (shifted - lse).astype(o_ref.dtype)
        else:
            o_ref[...] = logits.astype(o_ref.dtype)


def _pick_k_tile(hidden):
    # Prefer 256-aligned K slabs (v6e/v7x MXU is 2x256x256); 128 works on v5e.
    for tk in (512, 256, 128):
        if hidden % tk == 0:
            return tk
    # Small / odd hidden: use the full contraction dim as a single block
    # (block == full array dim satisfies the (8,128) rule).
    return hidden


def generator_forward(x, weight_t, bias, log_softmax=True, row_tile=None):
    """x: (..., hidden); weight_t: (hidden, vocab) [pre-transposed]; bias: (vocab,).

    Equivalent to: F.log_softmax(x @ weight_t + bias, dim=-1) (or raw logits).
    """
    hidden, vocab = weight_t.shape
    assert x.shape[-1] == hidden
    lead_shape = x.shape[:-1]
    x2d = x.reshape(-1, hidden)
    rows = x2d.shape[0]

    # --- tiling choices -----------------------------------------------------
    if row_tile is None:
        row_tile = min(256, _round_up(rows, 8))
    row_tile = _round_up(row_tile, 8)
    padded_rows = _round_up(rows, row_tile)
    if padded_rows != rows:
        x2d = jnp.pad(x2d, ((0, padded_rows - rows), (0, 0)))

    tk = _pick_k_tile(hidden)
    k_steps = hidden // tk
    grid = (padded_rows // row_tile, k_steps)

    b2d = bias.reshape(1, vocab)
    out_dtype = x.dtype

    # --- VMEM budget / cost hints -------------------------------------------
    xb = jnp.dtype(x2d.dtype).itemsize
    wb = jnp.dtype(weight_t.dtype).itemsize
    ob = jnp.dtype(out_dtype).itemsize
    vmem_bytes = (
        2 * row_tile * tk * xb          # x tile, double buffered
        + 2 * tk * vocab * wb           # weight K-slab, double buffered
        + 2 * row_tile * vocab * ob     # output tile, double buffered
        + row_tile * vocab * 4          # f32 accumulator scratch
        + 2 * vocab * jnp.dtype(bias.dtype).itemsize
    )
    vmem_limit = int(min(max(int(vmem_bytes * 1.25) + (1 << 20), 32 << 20), 64 << 20))

    cost = pl.CostEstimate(
        flops=2 * padded_rows * hidden * vocab,
        transcendentals=(padded_rows * vocab) if log_softmax else 0,
        bytes_accessed=(
            padded_rows * hidden * xb
            + hidden * vocab * wb
            + vocab * jnp.dtype(bias.dtype).itemsize
            + padded_rows * vocab * ob
        ),
    )

    kernel = functools.partial(_generator_kernel, log_softmax=log_softmax)

    out2d = pl.pallas_call(
        kernel,
        out_shape=jax.ShapeDtypeStruct((padded_rows, vocab), out_dtype),
        grid_spec=pltpu.PrefetchScalarGridSpec(
            num_scalar_prefetch=0,
            grid=grid,
            in_specs=[
                pl.BlockSpec((row_tile, tk), lambda i, k: (i, k)),
                pl.BlockSpec((tk, vocab), lambda i, k: (k, 0)),
                pl.BlockSpec((1, vocab), lambda i, k: (0, 0)),
            ],
            out_specs=pl.BlockSpec((row_tile, vocab), lambda i, k: (i, 0)),
            scratch_shapes=[pltpu.VMEM((row_tile, vocab), jnp.float32)],
        ),
        compiler_params=pltpu.CompilerParams(
            dimension_semantics=("parallel", "arbitrary"),
            vmem_limit_bytes=vmem_limit,
        ),
        cost_estimate=cost,
    )(x2d, weight_t, b2d)

    if padded_rows != rows:
        out2d = out2d[:rows]
    return out2d.reshape(*lead_shape, vocab)


def init_generator_params(key, hidden_size, output_size, dtype=jnp.float32):
    """Matches the PyTorch module: uniform(-stdv, stdv) weight, zero bias.

    Returns the weight already transposed to (hidden, vocab) so the forward
    path never materializes a per-call transpose. (From a PyTorch checkpoint,
    do `weight_t = torch_weight.T` once at load time.)
    """
    stdv = 1.0 / math.sqrt(hidden_size)
    weight = jax.random.uniform(
        key, (output_size, hidden_size), dtype=dtype, minval=-stdv, maxval=stdv
    )
    weight_t = weight.T  # one-time, outside the forward path
    bias = jnp.zeros((output_size,), dtype=dtype)
    return weight_t, bias


if __name__ == "__main__":
    hidden_size = 32
    output_size = 64
    batch, seq = 2, 8

    key = jax.random.PRNGKey(0)
    k_w, k_x = jax.random.split(key)

    weight_t, bias = init_generator_params(k_w, hidden_size, output_size)
    x = jax.random.normal(k_x, (batch, seq, hidden_size), dtype=jnp.float32)

    out = generator_forward(x, weight_t, bias, log_softmax=True)
    out = jax.block_until_ready(out)

    # Reference check in plain JAX.
    logits_ref = x.reshape(-1, hidden_size) @ weight_t + bias
    ref = jax.nn.log_softmax(logits_ref, axis=-1).reshape(batch, seq, output_size)
    assert out.shape == (batch, seq, output_size)
    assert jnp.allclose(out, ref, atol=1e-5, rtol=1e-5), "mismatch vs reference (log_softmax)"

    # Also check the raw-logits path (log_softmax=False).
    out_logits = jax.block_until_ready(
        generator_forward(x, weight_t, bias, log_softmax=False)
    )
    assert jnp.allclose(
        out_logits, logits_ref.reshape(batch, seq, output_size), atol=1e-5, rtol=1e-5
    ), "mismatch vs reference (logits)"

    print("KERNEL_OK")
</pallas_src>

<mosaic_0001>
module attributes {stable_mosaic.version = 11 : i64} {
  func.func @_generator_kernel(%arg0: i32, %arg1: i32, %arg2: memref<16x32xf32, #tpu.memory_space<vmem>>, %arg3: memref<32x64xf32, #tpu.memory_space<vmem>>, %arg4: memref<1x64xf32, #tpu.memory_space<vmem>>, %arg5: memref<16x64xf32, #tpu.memory_space<vmem>>, %arg6: memref<16x64xf32, #tpu.memory_space<vmem>>) attributes {dimension_semantics = [#tpu.dimension_semantics<parallel>, #tpu.dimension_semantics<arbitrary>], iteration_bounds = array<i64: 1, 1>, scalar_prefetch = 0 : i64, scratch_operands = 1 : i64, tpu.core_type = #tpu.core_type<tc>, window_params = [{transform_indices = @transform_0, window_bounds = array<i64: 16, 32>}, {transform_indices = @transform_1, window_bounds = array<i64: 32, 64>}, {pipeline_mode = #tpu.pipeline_mode<synchronous>, transform_indices = @transform_2, window_bounds = array<i64: 1, 64>}, {transform_indices = @transform_3, window_bounds = array<i64: 16, 64>}]} {
    %c0_i32 = arith.constant 0 : i32
    %0 = arith.cmpi eq, %arg1, %c0_i32 : i32
    %1 = arith.extui %0 : i1 to i32
    %c0_i32_0 = arith.constant 0 : i32
    %2 = arith.cmpi ne, %1, %c0_i32_0 : i32
    scf.if %2 {
      %cst_10 = arith.constant 0.000000e+00 : f32
      %12 = vector.broadcast %cst_10 : f32 to vector<16x64xf32>
      %c0_11 = arith.constant 0 : index
      %c0_12 = arith.constant 0 : index
      %13 = vector.load %arg6[%c0_11, %c0_12] : memref<16x64xf32, #tpu.memory_space<vmem>>, vector<16x64xf32>
      tpu.vector_store %arg6[%c0_11, %c0_12], %12 {strides = array<i32>} : memref<16x64xf32, #tpu.memory_space<vmem>>, vector<16x64xf32>,
    } else {
    }
    %c0 = arith.constant 0 : index
    %c0_1 = arith.constant 0 : index
    %3 = vector.load %arg6[%c0, %c0_1] : memref<16x64xf32, #tpu.memory_space<vmem>>, vector<16x64xf32>
    %c0_2 = arith.constant 0 : index
    %c0_3 = arith.constant 0 : index
    %4 = vector.load %arg2[%c0_2, %c0_3] : memref<16x32xf32, #tpu.memory_space<vmem>>, vector<16x32xf32>
    %c0_4 = arith.constant 0 : index
    %c0_5 = arith.constant 0 : index
    %5 = vector.load %arg3[%c0_4, %c0_5] : memref<32x64xf32, #tpu.memory_space<vmem>>, vector<32x64xf32>
    %cst = arith.constant dense<0.000000e+00> : vector<16x64xf32>
    %6 = tpu.matmul %4, %5, %cst {dimension_numbers = #tpu.dot_dimension_numbers<[1], [0], [0], [1], [0, 0, 1, 1], [], []>} : vector<16x32xf32>, vector<32x64xf32>, vector<16x64xf32> -> vector<16x64xf32>
    %7 = arith.addf %3, %6 : vector<16x64xf32>
    %c0_6 = arith.constant 0 : index
    %c0_7 = arith.constant 0 : index
    %8 = vector.load %arg6[%c0_6, %c0_7] : memref<16x64xf32, #tpu.memory_space<vmem>>, vector<16x64xf32>
    tpu.vector_store %arg6[%c0_6, %c0_7], %7 {strides = array<i32>} : memref<16x64xf32, #tpu.memory_space<vmem>>, vector<16x64xf32>,
    %c0_i32_8 = arith.constant 0 : i32
    %9 = arith.cmpi eq, %arg1, %c0_i32_8 : i32
    %10 = arith.extui %9 : i1 to i32
    %c0_i32_9 = arith.constant 0 : i32
    %11 = arith.cmpi ne, %10, %c0_i32_9 : i32
    scf.if %11 {
      %c0_10 = arith.constant 0 : index
      %c0_11 = arith.constant 0 : index
      %12 = vector.load %arg6[%c0_10, %c0_11] : memref<16x64xf32, #tpu.memory_space<vmem>>, vector<16x64xf32>
      %c0_12 = arith.constant 0 : index
      %c0_13 = arith.constant 0 : index
      %13 = vector.load %arg4[%c0_12, %c0_13] : memref<1x64xf32, #tpu.memory_space<vmem>>, vector<1x64xf32>
      %14 = vector.broadcast %13 : vector<1x64xf32> to vector<16x64xf32>
      %15 = arith.addf %12, %14 : vector<16x64xf32>
      %cst_14 = arith.constant dense<0xFF800000> : vector<16xf32>
      %16 = vector.multi_reduction <maximumf>, %15, %cst_14 [1] : vector<16x64xf32> to vector<16xf32>
      %17 = vector.shape_cast %16 : vector<16xf32> to vector<16x1xf32>
      %18 = vector.broadcast %17 : vector<16x1xf32> to vector<16x64xf32>
      %19 = arith.subf %15, %18 : vector<16x64xf32>
      %20 = math.exp %19 : vector<16x64xf32>
      %cst_15 = arith.constant dense<0.000000e+00> : vector<16xf32>
      %21 = vector.multi_reduction <add>, %20, %cst_15 [1] : vector<16x64xf32> to vector<16xf32>
      %22 = vector.shape_cast %21 : vector<16xf32> to vector<16x1xf32>
      %23 = math.log %22 : vector<16x1xf32>
      %24 = vector.broadcast %23 : vector<16x1xf32> to vector<16x64xf32>
      %25 = arith.subf %19, %24 : vector<16x64xf32>
      %c0_16 = arith.constant 0 : index
      %c0_17 = arith.constant 0 : index
      %26 = vector.load %arg5[%c0_16, %c0_17] : memref<16x64xf32, #tpu.memory_space<vmem>>, vector<16x64xf32>
      tpu.vector_store %arg5[%c0_16, %c0_17], %25 {strides = array<i32>} : memref<16x64xf32, #tpu.memory_space<vmem>>, vector<16x64xf32>,
    } else {
    }
    return
  }
  func.func @transform_0(%arg0: i32, %arg1: i32) -> (i32, i32) {
    %c0_i32 = arith.constant 0 : i32
    return %arg0, %arg1 : i32, i32
  }
  func.func @transform_1(%arg0: i32, %arg1: i32) -> (i32, i32) {
    %c0_i32 = arith.constant 0 : i32
    %c0_i32_0 = arith.constant 0 : i32
    return %arg1, %c0_i32 : i32, i32
  }
  func.func @transform_2(%arg0: i32, %arg1: i32) -> (i32, i32) {
    %c0_i32 = arith.constant 0 : i32
    %c0_i32_0 = arith.constant 0 : i32
    %c0_i32_1 = arith.constant 0 : i32
    return %c0_i32, %c0_i32_0 : i32, i32
  }
  func.func @transform_3(%arg0: i32, %arg1: i32) -> (i32, i32) {
    %c0_i32 = arith.constant 0 : i32
    %c0_i32_0 = arith.constant 0 : i32
    return %arg0, %c0_i32 : i32, i32
  }
}

</mosaic_0001>

<bundles_post_ra>
// kernel: tpu_custom_call.1
= control target key start
LH: loop header
LB: loop body
LE: loop exit
PB: predicated region body
PF: predicated region fallthrough
CT: control target
= control target key end

     0   :  { %8 = vsyncpa [#allocation4], 0  ;;  %s401_s0 = inlined_call_operand.hbm [shape: f32[16,32], index: 0, kind: input, shape index: {}]   ;;  %s402_s1 = inlined_call_operand.hbm [shape: f32[32,64], index: 1, kind: input, shape index: {}]   ;;  %s403_s2 = inlined_call_operand.vmem [shape: f32[1,64], index: 2, kind: input, shape index: {}]   ;;  %s404_s3 = inlined_call_operand.hbm [shape: f32[16,64], index: 3, kind: output, shape index: {}]  }
   0x1   :  { %9 = vsyncpa [#allocation7], 0 }
   0x2   :  { %10 = vsyncpa [#allocation5], 0  ;;  %s317_s12 = smov [#allocation3]   ;;  %s245_s16 = scalar_lea.hbm %s401_s0, 256 }
   0x3   :  { %s16_s13 = sshll.u32 %s317_s12, 4  ;;  %p246_p0 = scmp.ne.s32.totalorder %s401_s0, %s245_s16  ;;  %s17_s13 = int_to_ptr.vmem [resolvable:$true] %s16_s13 }
   0x4   :  { %p249_p1 = scmp.lt.u32.totalorder %s245_s16, %s401_s0 }
   0x6   :  { %p251_p2 = pnand %p249_p1, %p246_p0 }
   0x8   :  { %254 = shalt.err (!%p251_p2)
}
   0x9   :  { %s255_s21 = scalar_lea.vmem %s17_s13, 256  ;;  %p260_p4 = scmp.lt.s32.totalorder %s17_s13, %s17_s13 }
   0xa   :  { %p256_p3 = scmp.ne.s32.totalorder %s17_s13, %s255_s21  ;;  %p261_p5 = scmp.lt.s32.totalorder %s255_s21, %s255_s21 }
   0xc   :  { %p262_p6 = por %p261_p5, %p260_p4 }
   0xe   :  { %p263_p7 = pnand %p262_p6, %p256_p3 }
  0x10   :  { %266 = shalt.err (!%p263_p7)
}
  0x11   :  { %s318_s22 = smov 128   ;;  %s319_s23 = smov 8  }
  0x12   :  { %22 = dma.hbm_to_vmem [thread:$0]  %s401_s0, 256, %s17_s13, [#allocation4], %s318_s22, %s318_s22, %s319_s23  }
  0x13   :  { %s320_s26 = smov [#allocation6]   ;;  %s267_s30 = scalar_lea.hbm %s402_s1, 512 }
  0x14   :  { %s28_s27 = sshll.u32 %s320_s26, 4  ;;  %p268_p8 = scmp.ne.s32.totalorder %s402_s1, %s267_s30  ;;  %s29_s27 = int_to_ptr.vmem [resolvable:$true] %s28_s27 }
  0x15   :  { %p271_p9 = scmp.lt.u32.totalorder %s267_s30, %s402_s1 }
  0x17   :  { %p273_p10 = pnand %p271_p9, %p268_p8 }
  0x19   :  { %276 = shalt.err (!%p273_p10)
}
  0x1a   :  { %s277_s8 = scalar_lea.vmem %s29_s27, 512  ;;  %p282_p12 = scmp.lt.s32.totalorder %s29_s27, %s29_s27 }
  0x1b   :  { %p278_p11 = scmp.ne.s32.totalorder %s29_s27, %s277_s8  ;;  %p283_p13 = scmp.lt.s32.totalorder %s277_s8, %s277_s8 }
  0x1d   :  { %p284_p0 = por %p283_p13, %p282_p12 }
  0x1f   :  { %p285_p1 = pnand %p284_p0, %p278_p11 }
  0x21   :  { %288 = shalt.err (!%p285_p1)
}
  0x22   :  { %34 = dma.hbm_to_vmem [thread:$0]  %s402_s1, 512, %s29_s27, [#allocation7], %s318_s22, %s318_s22, %s319_s23  }
  0x23   :  { %311 = dma.done.wait [#allocation4], 256  }
  0x24   :  { %312 = vsyncadd [#allocation4], 4294967040 }
  0x25   :  { %313 = dma.done.wait [#allocation7], 512  }
  0x26   :  { %314 = vsyncadd [#allocation7], 4294966784  ;;  %vm47_vm0 = vcmask 523264   ;;  %v321_v0 = vmov 0.0   ;;  %vm58_vm1 = vcmask 261120   ;;  %v54_v1 = vld [vmem:[#allocation6] sm:$0xff] }
  0x27   :  { %49 = vst.msk [vmem:[#allocation2 + $0x8] sm:$0xff] %vm47_vm0, %v321_v0  ;;  %48 = vst.msk [vmem:[#allocation2] sm:$0xff] %vm47_vm0, %v321_v0  ;;  %v55_v2 = vld [vmem:[#allocation6 + $0x8] sm:$0xff]  ;;  %v56_v3 = vld [vmem:[#allocation6 + $0x10] sm:$0xff] }
  0x28   :  { %v223_v4 = vpack.c.bf16 %v55_v2, %v54_v1  ;;  %v57_v5 = vld [vmem:[#allocation6 + $0x18] sm:$0xff]  ;;  %v52_v6 = vld [vmem:[#allocation3] sm:$0xff]  ;;  %v205_v15 = vld [vmem:[%s403_s2] ss:$0 sm:$0xff]  ;;  %s322_s2 = smov [#allocation8]  }
  0x29   :  { %v227_v7 = vpack.c.bf16 %v57_v5, %v56_v3  ;;  %220 = vmatprep.mubr.msk.f32.mxu0 %vm58_vm1, %v52_v6  ;;  %v53_v8 = vld [vmem:[#allocation3 + $0x8] sm:$0xff]  ;;  %s190_s11 = sshll.u32 %s322_s2, 4  ;;  %s191_s11 = int_to_ptr.vmem [resolvable:$true] %s190_s11 }
  0x2a   :  { %224 = vmatprep.subr.bf16.mxu0 %v223_v4  ;;  %s289_s12 = scalar_lea.vmem %s191_s11, 256  ;;  %p294_p3 = scmp.lt.s32.totalorder %s191_s11, %s191_s11 }
  0x2b   :  { %226 = vmatpush3.bf16.msra.mxu0 %v223_v4  ;;  %p290_p2 = scmp.ne.s32.totalorder %s191_s11, %s289_s12  ;;  %p295_p4 = scmp.lt.s32.totalorder %s289_s12, %s289_s12 }
  0x2c   :  { %228 = vmatprep.subr.bf16.mxu0 %v227_v7 }
  0x2d   :  { %p296_p5 = por %p295_p4, %p294_p3 }
  0x2e   :  { %v51_v9 = vld [vmem:[#allocation2 + $0x8] sm:$0xff]  ;;  %v50_v10 = vld [vmem:[#allocation2] sm:$0xff] }
  0x2f   :  { %230 = vmatpush3.bf16.msra.mxu0 %v227_v7  ;;  %p297_p6 = pnand %p296_p5, %p290_p2 }
  0x32   :  { %221 = vmatmul.mubr.msk.f32.vlgmr.msra.gmra.mrb[0].mxu0 %vm58_vm1, %v53_v8 }
 0x105   :  { %v222_v11 = vpop.f32.mrb[0].mxu0 }
 0x106   :  { %v141_v12 = vadd.f32 %v222_v11, %v51_v9  ;;  %v131_v13 = vpop.f32.mrb[1].mxu0 }
 0x107   :  { %v140_v14 = vadd.f32 %v131_v13, %v50_v10 }
 0x108   :  { %144 = vst.msk [vmem:[#allocation2 + $0x8] sm:$0xff] %vm47_vm0, %v141_v12 }
 0x109   :  { %143 = vst.msk [vmem:[#allocation2] sm:$0xff] %vm47_vm0, %v140_v14 }
 0x10f   :  { %v149_v17 = vld [vmem:[#allocation2 + $0x8] sm:$0xff] }
 0x110   :  { %v148_v16 = vld [vmem:[#allocation2] sm:$0xff]  ;;  %v158_v20 = vadd.f32 %v205_v15, %v149_v17 }
 0x111   :  { %v157_v18 = vadd.f32 %v205_v15, %v148_v16 }
 0x112   :  { %v162_v21 = vsel %vm47_vm0, %v158_v20, -inf }
 0x113   :  { %v159_v19 = vsel %vm47_vm0, %v157_v18, -inf }
 0x114   :  { %160 = vmax.xlane.f32.xlu0 %v159_v19 }
 0x118   :  { %163 = vmax.xlane.f32.xlu0 %v162_v21 }
 0x1a1   :  { %v161_v22 = vpop.xlane.xlu0 %160 }
 0x1a2   :  { %v165_v23 = vsub.f32 %v157_v18, %v161_v22 }
 0x1a4   :  { %v167_v24 = vmul.f32 1.442695, %v165_v23 }
 0x1a5   :  { %v164_v25 = vpop.xlane.xlu0 %163 }
 0x1a6   :  { %237 = vpow2.f32 %v167_v24  ;;  %v166_v26 = vsub.f32 %v158_v20, %v164_v25 }
 0x1a8   :  { %v169_v27 = vmul.f32 1.442695, %v166_v26 }
 0x1aa   :  { %239 = vpow2.f32 %v169_v27 }
 0x1b0   :  { %v238_v28 = vpop.eup %237 }
 0x1b1   :  { %v171_v29 = vsel %vm47_vm0, %v238_v28, 0.0 }
 0x1b2   :  { %172 = vadd.xlane.f32.xlu1 %v171_v29 }
 0x1b4   :  { %v240_v30 = vpop.eup %239 }
 0x1b5   :  { %v174_v31 = vsel %vm47_vm0, %v240_v30, 0.0 }
 0x1b6   :  { %175 = vadd.xlane.f32.xlu1 %v174_v31 }
 0x23f   :  { %v173_v32 = vpop.xlane.xlu1 %172 }
 0x240   :  { %241 = vlog2.f32 %v173_v32 }
 0x243   :  { %v176_v33 = vpop.xlane.xlu1 %175 }
 0x244   :  { %243 = vlog2.f32 %v176_v33 }
 0x24a   :  { %v242_v34 = vpop.eup %241 }
 0x24b   :  { %v178_v35 = vmul.f32 0.6931472, %v242_v34 }
 0x24d   :  { %v181_v36 = vsub.f32 %v165_v23, %v178_v35 }
 0x24e   :  { %v244_v37 = vpop.eup %243 }
 0x24f   :  { %183 = vst.msk [vmem:[#allocation8] sm:$0xff] %vm47_vm0, %v181_v36  ;;  %v180_v38 = vmul.f32 0.6931472, %v244_v37 }
 0x251   :  { %v182_v39 = vsub.f32 %v166_v26, %v180_v38 }
 0x253   :  { %184 = vst.msk [vmem:[#allocation8 + $0x8] sm:$0xff] %vm47_vm0, %v182_v39 }
 0x254   :  { %300 = shalt.err (!%p297_p6)
}
 0x255   :  { %s301_s15 = scalar_lea.hbm %s404_s3, 256 }
 0x256   :  { %p302_p7 = scmp.ne.s32.totalorder %s404_s3, %s301_s15  ;;  %p305_p8 = scmp.lt.u32.totalorder %s301_s15, %s404_s3 }
 0x258   :  { %p307_p9 = pnand %p305_p8, %p302_p7 }
 0x25a   :  { %310 = shalt.err (!%p307_p9)
}
 0x25b   :  { %196 = dma.vmem_to_hbm [thread:$0]  %s191_s11, 256, %s404_s3, [#allocation5], %s318_s22, %s318_s22, %s319_s23  }
 0x25c   :  { %315 = dma.done.wait [#allocation5], 256  }
 0x25d   :  { %316 = vsyncadd [#allocation5], 4294967040 }
 0x25e   :  { %200 = vsyncpa [#allocation4], 1 }
 0x25f   :  { %201 = vsyncpa [#allocation7], 1 }
 0x260   :  { %202 = vsyncpa [#allocation5], 1 }

</bundles_post_ra>
